<compile_context>
chip_gen: v5e
topology: v5e:2x2
jax: 0.10.0
libtpu: 0.0.40
codegen_flags: <defaults>
</compile_context>

<pallas_src>
import jax
import jax.numpy as jnp
from jax import lax
from jax.experimental import pallas as pl
from jax.experimental.pallas import tpu as pltpu

HIDDEN = 256
MAX_TM = 1024


def _round_up(n, m):
    return ((n + m - 1) // m) * m


def _choose_tm(batch):
    """Batch-tile size: >=2 tiles when the batch allows (v7x megacore),
    multiples of 256 for large tiles (v6e/v7x MXU M dim), 128 otherwise (v5e),
    capped at MAX_TM. Keeps padding below one tile."""
    if batch <= 128:
        return 128
    half = pl.cdiv(batch, 2)
    tm = _round_up(half, 256) if half >= 256 else _round_up(half, 128)
    return min(MAX_TM, tm)


def soft_q_kernel(x_ref, a_ref, w1x_ref, w1a_ref, b1_ref, w2_ref, b2_ref,
                  w3_ref, b3_ref, out_ref):
    bf16, f32 = jnp.bfloat16, jnp.float32

    # fc1 with the concat folded in: h1 = relu(x @ w1x + a @ w1a + b1)
    h1 = jnp.dot(x_ref[...].astype(bf16), w1x_ref[...], preferred_element_type=f32)
    h1 = h1 + jnp.dot(a_ref[...].astype(bf16), w1a_ref[...], preferred_element_type=f32)
    h1 = jnp.maximum(h1 + b1_ref[...], 0.0)                       # (TM, 256) f32

    # fc2
    h2 = jnp.dot(h1.astype(bf16), w2_ref[...], preferred_element_type=f32)
    h2 = jnp.maximum(h2 + b2_ref[...], 0.0)                       # (TM, 256) f32

    # fc3: contract last dims of (1,256) x (TM,256) -> lane-dense (1, TM) row
    q = lax.dot_general(w3_ref[...], h2.astype(bf16),
                        dimension_numbers=(((1,), (1,)), ((), ())),
                        preferred_element_type=f32)               # (1, TM)
    out_ref[...] = (q + b3_ref[...]).astype(out_ref.dtype)


def soft_q_forward(x, a, params):
    """x: (B, obs_dim) f32, a: (B, act_dim) f32 -> (B, 1) f32."""
    w1x, w1a, b1, w2, b2, w3, b3 = params
    B, obs_dim = x.shape
    act_dim = a.shape[1]

    tm = _choose_tm(B)
    num_tiles = pl.cdiv(B, tm)
    b_pad = num_tiles * tm
    if b_pad != B:
        # Only the ragged tail tile is padded (< one tile of rows); padded rows
        # produce bias-only values and are sliced off below.
        x = jnp.pad(x, ((0, b_pad - B), (0, 0)))
        a = jnp.pad(a, ((0, b_pad - B), (0, 0)))

    # Weights/biases: full-array blocks with constant index_map -> fetched once,
    # VMEM-resident across all batch tiles.
    full2d = lambda arr: pl.BlockSpec(arr.shape, lambda i: (0, 0))

    flops = 2 * b_pad * HIDDEN * (obs_dim + act_dim + HIDDEN + 1)
    bytes_accessed = (
        (int(x.size) + int(a.size)) * 4                              # x, a (f32)
        + sum(int(w.size) * w.dtype.itemsize for w in (w1x, w1a, w2, w3))
        + sum(int(b.size) * 4 for b in (b1, b2, b3))
        + b_pad * 4)                                                 # output (f32)

    out = pl.pallas_call(
        soft_q_kernel,
        out_shape=jax.ShapeDtypeStruct((1, b_pad), jnp.float32),
        grid=(num_tiles,),
        in_specs=[
            pl.BlockSpec((tm, obs_dim), lambda i: (i, 0)),   # x batch tile
            pl.BlockSpec((tm, act_dim), lambda i: (i, 0)),   # a batch tile
            full2d(w1x), full2d(w1a), full2d(b1),
            full2d(w2), full2d(b2),
            full2d(w3), full2d(b3),
        ],
        out_specs=pl.BlockSpec((1, tm), lambda i: (0, i)),
        compiler_params=pltpu.CompilerParams(
            dimension_semantics=("parallel",)),
        cost_estimate=pl.CostEstimate(
            flops=flops, transcendentals=0, bytes_accessed=bytes_accessed),
    )(x, a, w1x, w1a, b1, w2, b2, w3, b3)

    # (1, b_pad): column j holds q for batch row j; recover the (B, 1) view.
    return out[0, :B].reshape(B, 1)


def init_params(key, obs_dim, act_dim, hidden=HIDDEN):
    """PyTorch nn.Linear-style init (U[-1/sqrt(fan_in), +]); weights stored bf16
    as (in, out), biases f32, fc1 split into obs/act halves, fc3 as a (1, h) row."""
    def linear(key, fan_in, fan_out):
        kw, kb = jax.random.split(key)
        bound = 1.0 / jnp.sqrt(float(fan_in))
        w = jax.random.uniform(kw, (fan_in, fan_out), jnp.float32, -bound, bound)
        b = jax.random.uniform(kb, (1, fan_out), jnp.float32, -bound, bound)
        return w, b

    d_in = obs_dim + act_dim
    k1, k2, k3 = jax.random.split(key, 3)
    w1, b1 = linear(k1, d_in, hidden)      # fc1 acts on concat([x, a])
    w2, b2 = linear(k2, hidden, hidden)
    w3, b3 = linear(k3, hidden, 1)

    w1x = w1[:obs_dim].astype(jnp.bfloat16)     # (obs_dim, hidden)
    w1a = w1[obs_dim:].astype(jnp.bfloat16)     # (act_dim, hidden)
    return (w1x, w1a, b1,
            w2.astype(jnp.bfloat16), b2,
            w3.T.astype(jnp.bfloat16),          # (1, hidden) row
            b3.reshape(1, 1))


def ref_forward(x, a, params):
    """Pure-JAX reference mirroring the kernel's bf16/f32 math."""
    w1x, w1a, b1, w2, b2, w3, b3 = params
    bf16, f32 = jnp.bfloat16, jnp.float32
    h1 = (jnp.dot(x.astype(bf16), w1x, preferred_element_type=f32)
          + jnp.dot(a.astype(bf16), w1a, preferred_element_type=f32) + b1)
    h1 = jnp.maximum(h1, 0.0)
    h2 = jnp.maximum(jnp.dot(h1.astype(bf16), w2, preferred_element_type=f32) + b2, 0.0)
    return jnp.dot(h2.astype(bf16), w3.T, preferred_element_type=f32) + b3


if __name__ == "__main__":
    # Small shapes consistent with the module: flat observation + flat action.
    obs_dim, act_dim = 16, 8
    key = jax.random.PRNGKey(0)
    kx, ka, kp, kx2, ka2 = jax.random.split(key, 5)
    params = init_params(kp, obs_dim, act_dim)

    # Single-tile path (B=8 -> TM=128, grid=(1,)).
    batch = 8
    x = jax.random.normal(kx, (batch, obs_dim), jnp.float32)
    a = jax.random.normal(ka, (batch, act_dim), jnp.float32)
    q = soft_q_forward(x, a, params)
    jax.block_until_ready(q)
    ref = ref_forward(x, a, params)
    assert q.shape == (batch, 1)
    assert jnp.allclose(q, ref, atol=2e-2, rtol=2e-2), float(jnp.max(jnp.abs(q - ref)))

    # Multi-tile path (B=256 -> TM=128, grid=(2,)): exercises the batch-tile
    # index_map, megacore sharding, and the (1, B) lane-dense output ordering.
    batch2 = 256
    x2 = jax.random.normal(kx2, (batch2, obs_dim), jnp.float32)
    a2 = jax.random.normal(ka2, (batch2, act_dim), jnp.float32)
    q2 = soft_q_forward(x2, a2, params)
    jax.block_until_ready(q2)
    ref2 = ref_forward(x2, a2, params)
    assert q2.shape == (batch2, 1)
    assert jnp.allclose(q2, ref2, atol=2e-2, rtol=2e-2), float(jnp.max(jnp.abs(q2 - ref2)))

    print("KERNEL_OK")
</pallas_src>

<mosaic_0001>
module attributes {stable_mosaic.version = 11 : i64} {
  func.func @soft_q_kernel(%arg0: i32, %arg1: memref<128x16xf32, #tpu.memory_space<vmem>>, %arg2: memref<128x8xf32, #tpu.memory_space<vmem>>, %arg3: memref<16x256xbf16, #tpu.memory_space<vmem>>, %arg4: memref<8x256xbf16, #tpu.memory_space<vmem>>, %arg5: memref<1x256xf32, #tpu.memory_space<vmem>>, %arg6: memref<256x256xbf16, #tpu.memory_space<vmem>>, %arg7: memref<1x256xf32, #tpu.memory_space<vmem>>, %arg8: memref<1x256xbf16, #tpu.memory_space<vmem>>, %arg9: memref<1x1xf32, #tpu.memory_space<vmem>>, %arg10: memref<1x128xf32, #tpu.memory_space<vmem>>) attributes {dimension_semantics = [#tpu.dimension_semantics<parallel>], iteration_bounds = array<i64: 1>, scalar_prefetch = 0 : i64, scratch_operands = 0 : i64, tpu.core_type = #tpu.core_type<tc>, window_params = [{transform_indices = @transform_0, window_bounds = array<i64: 128, 16>}, {transform_indices = @transform_1, window_bounds = array<i64: 128, 8>}, {pipeline_mode = #tpu.pipeline_mode<synchronous>, transform_indices = @transform_2, window_bounds = array<i64: 16, 256>}, {pipeline_mode = #tpu.pipeline_mode<synchronous>, transform_indices = @transform_3, window_bounds = array<i64: 8, 256>}, {pipeline_mode = #tpu.pipeline_mode<synchronous>, transform_indices = @transform_4, window_bounds = array<i64: 1, 256>}, {pipeline_mode = #tpu.pipeline_mode<synchronous>, transform_indices = @transform_5, window_bounds = array<i64: 256, 256>}, {pipeline_mode = #tpu.pipeline_mode<synchronous>, transform_indices = @transform_6, window_bounds = array<i64: 1, 256>}, {pipeline_mode = #tpu.pipeline_mode<synchronous>, transform_indices = @transform_7, window_bounds = array<i64: 1, 256>}, {pipeline_mode = #tpu.pipeline_mode<synchronous>, transform_indices = @transform_8, window_bounds = array<i64: 1, 1>}, {transform_indices = @transform_9, window_bounds = array<i64: 1, 128>}]} {
    %c0 = arith.constant 0 : index
    %c0_0 = arith.constant 0 : index
    %0 = vector.load %arg1[%c0, %c0_0] : memref<128x16xf32, #tpu.memory_space<vmem>>, vector<128x16xf32>
    %1 = arith.truncf %0 : vector<128x16xf32> to vector<128x16xbf16>
    %c0_1 = arith.constant 0 : index
    %c0_2 = arith.constant 0 : index
    %2 = vector.load %arg3[%c0_1, %c0_2] : memref<16x256xbf16, #tpu.memory_space<vmem>>, vector<16x256xbf16>
    %cst = arith.constant dense<0.000000e+00> : vector<128x256xf32>
    %3 = tpu.matmul %1, %2, %cst {dimension_numbers = #tpu.dot_dimension_numbers<[1], [0], [0], [1], [0, 0, 1, 1], [], []>} : vector<128x16xbf16>, vector<16x256xbf16>, vector<128x256xf32> -> vector<128x256xf32>
    %c0_3 = arith.constant 0 : index
    %c0_4 = arith.constant 0 : index
    %4 = vector.load %arg2[%c0_3, %c0_4] : memref<128x8xf32, #tpu.memory_space<vmem>>, vector<128x8xf32>
    %5 = arith.truncf %4 : vector<128x8xf32> to vector<128x8xbf16>
    %c0_5 = arith.constant 0 : index
    %c0_6 = arith.constant 0 : index
    %6 = vector.load %arg4[%c0_5, %c0_6] : memref<8x256xbf16, #tpu.memory_space<vmem>>, vector<8x256xbf16>
    %cst_7 = arith.constant dense<0.000000e+00> : vector<128x256xf32>
    %7 = tpu.matmul %5, %6, %cst_7 {dimension_numbers = #tpu.dot_dimension_numbers<[1], [0], [0], [1], [0, 0, 1, 1], [], []>} : vector<128x8xbf16>, vector<8x256xbf16>, vector<128x256xf32> -> vector<128x256xf32>
    %8 = arith.addf %3, %7 : vector<128x256xf32>
    %c0_8 = arith.constant 0 : index
    %c0_9 = arith.constant 0 : index
    %9 = vector.load %arg5[%c0_8, %c0_9] : memref<1x256xf32, #tpu.memory_space<vmem>>, vector<1x256xf32>
    %10 = vector.broadcast %9 : vector<1x256xf32> to vector<128x256xf32>
    %11 = arith.addf %8, %10 : vector<128x256xf32>
    %cst_10 = arith.constant 0.000000e+00 : f32
    %12 = vector.broadcast %cst_10 : f32 to vector<128x256xf32>
    %13 = arith.maximumf %11, %12 : vector<128x256xf32>
    %14 = arith.truncf %13 : vector<128x256xf32> to vector<128x256xbf16>
    %c0_11 = arith.constant 0 : index
    %c0_12 = arith.constant 0 : index
    %15 = vector.load %arg6[%c0_11, %c0_12] : memref<256x256xbf16, #tpu.memory_space<vmem>>, vector<256x256xbf16>
    %cst_13 = arith.constant dense<0.000000e+00> : vector<128x256xf32>
    %16 = tpu.matmul %14, %15, %cst_13 {dimension_numbers = #tpu.dot_dimension_numbers<[1], [0], [0], [1], [0, 0, 1, 1], [], []>} : vector<128x256xbf16>, vector<256x256xbf16>, vector<128x256xf32> -> vector<128x256xf32>
    %c0_14 = arith.constant 0 : index
    %c0_15 = arith.constant 0 : index
    %17 = vector.load %arg7[%c0_14, %c0_15] : memref<1x256xf32, #tpu.memory_space<vmem>>, vector<1x256xf32>
    %18 = vector.broadcast %17 : vector<1x256xf32> to vector<128x256xf32>
    %19 = arith.addf %16, %18 : vector<128x256xf32>
    %cst_16 = arith.constant 0.000000e+00 : f32
    %20 = vector.broadcast %cst_16 : f32 to vector<128x256xf32>
    %21 = arith.maximumf %19, %20 : vector<128x256xf32>
    %c0_17 = arith.constant 0 : index
    %c0_18 = arith.constant 0 : index
    %22 = vector.load %arg8[%c0_17, %c0_18] : memref<1x256xbf16, #tpu.memory_space<vmem>>, vector<1x256xbf16>
    %23 = arith.truncf %21 : vector<128x256xf32> to vector<128x256xbf16>
    %cst_19 = arith.constant dense<0.000000e+00> : vector<1x128xf32>
    %24 = tpu.matmul %22, %23, %cst_19 {dimension_numbers = #tpu.dot_dimension_numbers<[1], [1], [0], [0], [0, 0, 1, 0], [], []>} : vector<1x256xbf16>, vector<128x256xbf16>, vector<1x128xf32> -> vector<1x128xf32>
    %c0_20 = arith.constant 0 : index
    %c0_21 = arith.constant 0 : index
    %25 = vector.load %arg9[%c0_20, %c0_21] : memref<1x1xf32, #tpu.memory_space<vmem>>, vector<1x1xf32>
    %26 = vector.broadcast %25 : vector<1x1xf32> to vector<1x128xf32>
    %27 = arith.addf %24, %26 : vector<1x128xf32>
    %c0_22 = arith.constant 0 : index
    %c0_23 = arith.constant 0 : index
    %28 = vector.load %arg10[%c0_22, %c0_23] : memref<1x128xf32, #tpu.memory_space<vmem>>, vector<1x128xf32>
    tpu.vector_store %arg10[%c0_22, %c0_23], %27 {strides = array<i32>} : memref<1x128xf32, #tpu.memory_space<vmem>>, vector<1x128xf32>,
    return
  }
  func.func @transform_0(%arg0: i32) -> (i32, i32) {
    %c0_i32 = arith.constant 0 : i32
    %c0_i32_0 = arith.constant 0 : i32
    return %arg0, %c0_i32 : i32, i32
  }
  func.func @transform_1(%arg0: i32) -> (i32, i32) {
    %c0_i32 = arith.constant 0 : i32
    %c0_i32_0 = arith.constant 0 : i32
    return %arg0, %c0_i32 : i32, i32
  }
  func.func @transform_2(%arg0: i32) -> (i32, i32) {
    %c0_i32 = arith.constant 0 : i32
    %c0_i32_0 = arith.constant 0 : i32
    %c0_i32_1 = arith.constant 0 : i32
    return %c0_i32, %c0_i32_0 : i32, i32
  }
  func.func @transform_3(%arg0: i32) -> (i32, i32) {
    %c0_i32 = arith.constant 0 : i32
    %c0_i32_0 = arith.constant 0 : i32
    %c0_i32_1 = arith.constant 0 : i32
    return %c0_i32, %c0_i32_0 : i32, i32
  }
  func.func @transform_4(%arg0: i32) -> (i32, i32) {
    %c0_i32 = arith.constant 0 : i32
    %c0_i32_0 = arith.constant 0 : i32
    %c0_i32_1 = arith.constant 0 : i32
    return %c0_i32, %c0_i32_0 : i32, i32
  }
  func.func @transform_5(%arg0: i32) -> (i32, i32) {
    %c0_i32 = arith.constant 0 : i32
    %c0_i32_0 = arith.constant 0 : i32
    %c0_i32_1 = arith.constant 0 : i32
    return %c0_i32, %c0_i32_0 : i32, i32
  }
  func.func @transform_6(%arg0: i32) -> (i32, i32) {
    %c0_i32 = arith.constant 0 : i32
    %c0_i32_0 = arith.constant 0 : i32
    %c0_i32_1 = arith.constant 0 : i32
    return %c0_i32, %c0_i32_0 : i32, i32
  }
  func.func @transform_7(%arg0: i32) -> (i32, i32) {
    %c0_i32 = arith.constant 0 : i32
    %c0_i32_0 = arith.constant 0 : i32
    %c0_i32_1 = arith.constant 0 : i32
    return %c0_i32, %c0_i32_0 : i32, i32
  }
  func.func @transform_8(%arg0: i32) -> (i32, i32) {
    %c0_i32 = arith.constant 0 : i32
    %c0_i32_0 = arith.constant 0 : i32
    %c0_i32_1 = arith.constant 0 : i32
    return %c0_i32, %c0_i32_0 : i32, i32
  }
  func.func @transform_9(%arg0: i32) -> (i32, i32) {
    %c0_i32 = arith.constant 0 : i32
    %c0_i32_0 = arith.constant 0 : i32
    return %c0_i32, %arg0 : i32, i32
  }
}

</mosaic_0001>

<bundles_post_ra>
// kernel: tpu_custom_call.1
= control target key start
LH: loop header
LB: loop body
LE: loop exit
PB: predicated region body
PF: predicated region fallthrough
CT: control target
= control target key end

     0   :  { %s1675_s0 = inlined_call_operand.vmem [shape: f32[128,16], index: 0, kind: input, shape index: {}]   ;;  %s1676_s1 = inlined_call_operand.vmem [shape: f32[128,8], index: 1, kind: input, shape index: {}]   ;;  %s1677_s2 = inlined_call_operand.vmem [shape: bf16[16,256], index: 2, kind: input, shape index: {}]   ;;  %s1678_s3 = inlined_call_operand.vmem [shape: bf16[8,256], index: 3, kind: input, shape index: {}]   ;;  %s1679_s4 = inlined_call_operand.vmem [shape: f32[1,256], index: 4, kind: input, shape index: {}]   ;;  %s1680_s5 = inlined_call_operand.vmem [shape: bf16[256,256], index: 5, kind: input, shape index: {}]   ;;  %s1681_s6 = inlined_call_operand.vmem [shape: f32[1,256], index: 6, kind: input, shape index: {}]   ;;  %s1682_s7 = inlined_call_operand.vmem [shape: bf16[1,256], index: 7, kind: input, shape index: {}]   ;;  %s1683_s8 = inlined_call_operand.<no memory space> [shape: f32[1,1], index: 8, kind: input, shape index: {}]   ;;  %s1684_s9 = inlined_call_operand.hbm [shape: f32[1,128], index: 9, kind: output, shape index: {}]  }
   0x1   :  { %v14_v0 = vstv %s1683_s8 }
   0x2   :  { %15 = vst [vmem:[#allocation2] sm:$0x1] %v14_v0 }
   0x3   :  { %v958_v1 = vld [vmem:[%s1677_s2] sm:$0xf]  ;;  %v1109_v2 = vld [vmem:[%s1677_s2 + $0x4] sm:$0xf0]  ;;  %v1108_v3 = vld [vmem:[%s1677_s2 + $0x4] sm:$0xf] }
   0x4   :  { %v959_v4 = vor.u32 %v1109_v2, %v958_v1  ;;  %v960_v5 = vld [vmem:[%s1677_s2 + $0x8] sm:$0xf0]  ;;  %v86_v6 = vld [vmem:[%s1678_s3] sm:$0xff]  ;;  %vm117_vm0 = vcmask 1043456   ;;  %vm232_vm1 = vcmask 130048  }
   0x5   :  { %v36_v7 = vld [vmem:[%s1675_s0] sm:$0xff]  ;;  %v963_v8 = vor.u32 %v1108_v3, %v960_v5  ;;  %v88_v9 = vunpack.c.l.b16 %v86_v6  ;;  %v89_v10 = vunpack.c.h.b16 %v86_v6  ;;  %v37_v11 = vld [vmem:[%s1675_s0 + $0x8] sm:$0xff] }
   0x6   :  { %264 = vmatpush.bf16.msra.mxu2 %v959_v4  ;;  %v52_v12 = vpack.c.bf16 %v37_v11, %v36_v7  ;;  %v62_v13 = vld [vmem:[%s1676_s1] sm:$0xff]  ;;  %v63_v14 = vld [vmem:[%s1676_s1 + $0x8] sm:$0xff] }
   0x7   :  { %313 = vmatpush.bf16.msra.mxu3 %v963_v8  ;;  %v90_v15 = vpack.c.b16 %v88_v9, %v88_v9  ;;  %v91_v16 = vpack.c.b16 %v89_v10, %v89_v10 }
   0x8   :  { %16 = vsyncpa [#allocation4], 0  ;;  %v78_v19 = vpack.c.bf16 %v63_v14, %v62_v13  ;;  %vm92_vm2 = vcmask 64512   ;;  %v38_v20 = vld [vmem:[%s1675_s0 + $0x10] sm:$0xff]  ;;  %v39_v21 = vld [vmem:[%s1675_s0 + $0x18] sm:$0xff]  ;;  %s931_s22 = sshll.u32 %s1684_s9, 4  ;;  %s932_s22 = int_to_ptr.hbm [resolvable:$true] %s931_s22 }
   0x9   :  { %v119_v17 = vsel %vm117_vm0, %v90_v15, 0  ;;  %v122_v18 = vsel %vm117_vm0, %v91_v16, 0  ;;  %964 = vmatmul.msk.bf16.vlgmr.msra.gmra.mxu2 %vm232_vm1, %v52_v12  ;;  %v53_v22 = vpack.c.bf16 %v39_v21, %v38_v20  ;;  %v64_v23 = vld [vmem:[%s1676_s1 + $0x10] sm:$0xff]  ;;  %v65_v24 = vld [vmem:[%s1676_s1 + $0x18] sm:$0xff]  ;;  %v40_v26 = vld [vmem:[%s1675_s0 + $0x20] sm:$0xff] }
   0xa   :  { %131 = vmatpush.bf16.msra.mxu0 %v119_v17  ;;  %180 = vmatpush.bf16.msra.mxu1 %v122_v18  ;;  %v79_v25 = vpack.c.bf16 %v65_v24, %v64_v23  ;;  %v41_v27 = vld [vmem:[%s1675_s0 + $0x28] sm:$0xff]  ;;  %v66_v29 = vld [vmem:[%s1676_s1 + $0x20] sm:$0xff]  ;;  %v42_v32 = vld [vmem:[%s1675_s0 + $0x30] sm:$0xff] }
   0xb   :  { %972 = vmatmul.msk.bf16.vlgmr.msra.gmra.mxu3 %vm232_vm1, %v52_v12  ;;  %v54_v28 = vpack.c.bf16 %v41_v27, %v40_v26  ;;  %v67_v30 = vld [vmem:[%s1676_s1 + $0x28] sm:$0xff]  ;;  %v43_v33 = vld [vmem:[%s1675_s0 + $0x38] sm:$0xff]  ;;  %v68_v35 = vld [vmem:[%s1676_s1 + $0x30] sm:$0xff] }
   0xc   :  { %v80_v31 = vpack.c.bf16 %v67_v30, %v66_v29  ;;  %v55_v34 = vpack.c.bf16 %v43_v33, %v42_v32  ;;  %v69_v36 = vld [vmem:[%s1676_s1 + $0x38] sm:$0xff]  ;;  %v1124_v38 = vld [vmem:[%s1680_s5 + $0x74] sm:$0xf]  ;;  %v1038_v43 = vld [vmem:[%s1680_s5 + $0x70] sm:$0xf] }
   0xd   :  { %940 = vmatmul.msk.bf16.vlgmr.msra.gmra.mxu0 %vm92_vm2, %v78_v19  ;;  %948 = vmatmul.msk.bf16.vlgmr.msra.gmra.mxu1 %vm92_vm2, %v78_v19  ;;  %v81_v37 = vpack.c.bf16 %v69_v36, %v68_v35  ;;  %v1040_v39 = vld [vmem:[%s1680_s5 + $0x78] sm:$0xf0]  ;;  %v1140_v40 = vld [vmem:[%s1680_s5 + $0xf4] sm:$0xf]  ;;  %v1125_v44 = vld [vmem:[%s1680_s5 + $0x74] sm:$0xf0] }
   0xe   :  { %v1043_v41 = vor.u32 %v1124_v38, %v1040_v39  ;;  %v1104_v42 = vld [vmem:[%s1680_s5 + $0xf8] sm:$0xf0]  ;;  %v1039_v46 = vor.u32 %v1125_v44, %v1038_v43  ;;  %v1102_v47 = vld [vmem:[%s1680_s5 + $0xf0] sm:$0xf]  ;;  %v1141_v48 = vld [vmem:[%s1680_s5 + $0xf4] sm:$0xf0] }
   0xf   :  { %v1107_v45 = vor.u32 %v1140_v40, %v1104_v42  ;;  %v1103_v49 = vor.u32 %v1141_v48, %v1102_v47  ;;  %v44_v50 = vld [vmem:[%s1675_s0 + $0x40] sm:$0xff]  ;;  %v45_v51 = vld [vmem:[%s1675_s0 + $0x48] sm:$0xff]  ;;  %v46_v4 = vld [vmem:[%s1675_s0 + $0x50] sm:$0xff] }
  0x10   :  { %737 = vmatpush.bf16.msrb.mxu2 %v1043_v41  ;;  %639 = vmatpush.bf16.msrb.mxu0 %v1039_v46  ;;  %v56_v52 = vpack.c.bf16 %v45_v51, %v44_v50  ;;  %v70_v53 = vld [vmem:[%s1676_s1 + $0x40] sm:$0xff]  ;;  %v71_v54 = vld [vmem:[%s1676_s1 + $0x48] sm:$0xff]  ;;  %v47_v5 = vld [vmem:[%s1675_s0 + $0x58] sm:$0xff] }
  0x11   :  { %786 = vmatpush.bf16.msrb.mxu3 %v1107_v45  ;;  %688 = vmatpush.bf16.msrb.mxu1 %v1103_v49  ;;  %v82_v55 = vpack.c.bf16 %v71_v54, %v70_v53  ;;  %v1122_v56 = vld [vmem:[%s1680_s5 + $0x64] sm:$0xf]  ;;  %v1032_v57 = vld [vmem:[%s1680_s5 + $0x68] sm:$0xf0]  ;;  %v1030_v61 = vld [vmem:[%s1680_s5 + $0x60] sm:$0xf]  ;;  %v57_v6 = vpack.c.bf16 %v47_v5, %v46_v4 }
  0x12   :  { %v1138_v58 = vld [vmem:[%s1680_s5 + $0xe4] sm:$0xf]  ;;  %v1035_v59 = vor.u32 %v1122_v56, %v1032_v57  ;;  %v1096_v60 = vld [vmem:[%s1680_s5 + $0xe8] sm:$0xf0]  ;;  %v1123_v62 = vld [vmem:[%s1680_s5 + $0x64] sm:$0xf0] }
  0x13   :  { %v1099_v63 = vor.u32 %v1138_v58, %v1096_v60  ;;  %v1031_v0 = vor.u32 %v1123_v62, %v1030_v61  ;;  %v1094_v1 = vld [vmem:[%s1680_s5 + $0xe0] sm:$0xf]  ;;  %v1139_v2 = vld [vmem:[%s1680_s5 + $0xe4] sm:$0xf0]  ;;  %v72_v7 = vld [vmem:[%s1676_s1 + $0x50] sm:$0xff] }
  0x14   :  { %738 = vmatpush.bf16.msrb.mxu2 %v1035_v59  ;;  %v1095_v3 = vor.u32 %v1139_v2, %v1094_v1  ;;  %v73_v8 = vld [vmem:[%s1676_s1 + $0x58] sm:$0xff]  ;;  %v1120_v10 = vld [vmem:[%s1680_s5 + $0x54] sm:$0xf]  ;;  %v1022_v15 = vld [vmem:[%s1680_s5 + $0x50] sm:$0xf] }
  0x15   :  { %787 = vmatpush.bf16.msrb.mxu3 %v1099_v63  ;;  %640 = vmatpush.bf16.msrb.mxu0 %v1031_v0  ;;  %v83_v9 = vpack.c.bf16 %v73_v8, %v72_v7  ;;  %v1024_v11 = vld [vmem:[%s1680_s5 + $0x58] sm:$0xf0]  ;;  %v1136_v12 = vld [vmem:[%s1680_s5 + $0xd4] sm:$0xf]  ;;  %v1121_v16 = vld [vmem:[%s1680_s5 + $0x54] sm:$0xf0] }
  0x16   :  { %689 = vmatpush.bf16.msrb.mxu1 %v1095_v3  ;;  %v1027_v13 = vor.u32 %v1120_v10, %v1024_v11  ;;  %v1088_v14 = vld [vmem:[%s1680_s5 + $0xd8] sm:$0xf0]  ;;  %v1023_v18 = vor.u32 %v1121_v16, %v1022_v15  ;;  %v1086_v19 = vld [vmem:[%s1680_s5 + $0xd0] sm:$0xf]  ;;  %v1137_v20 = vld [vmem:[%s1680_s5 + $0xd4] sm:$0xf0] }
  0x17   :  { %v1091_v17 = vor.u32 %v1136_v12, %v1088_v14  ;;  %v1087_v21 = vor.u32 %v1137_v20, %v1086_v19  ;;  %v49_v23 = vld [vmem:[%s1675_s0 + $0x68] sm:$0xff]  ;;  %v1078_v30 = vld [vmem:[%s1680_s5 + $0xc0] sm:$0xf]  ;;  %v1118_v33 = vld [vmem:[%s1680_s5 + $0x44] sm:$0xf] }
  0x18   :  { %739 = vmatpush.bf16.msrb.mxu2 %v1027_v13  ;;  %v75_v26 = vld [vmem:[%s1676_s1 + $0x68] sm:$0xff]  ;;  %v1006_v40 = vld [vmem:[%s1680_s5 + $0x30] sm:$0xf]  ;;  %v1117_v41 = vld [vmem:[%s1680_s5 + $0x34] sm:$0xf0] }
  0x19   :  { %965 = vmatmul.msk.bf16.gmra.mxu2 %vm232_vm1, %v53_v22  ;;  %788 = vmatpush.bf16.msrb.mxu3 %v1091_v17  ;;  %v1119_v29 = vld [vmem:[%s1680_s5 + $0x44] sm:$0xf0]  ;;  %v1080_v38 = vld [vmem:[%s1680_s5 + $0xc8] sm:$0xf0]  ;;  %v1007_v42 = vor.u32 %v1117_v41, %v1006_v40  ;;  %v1070_v43 = vld [vmem:[%s1680_s5 + $0xb0] sm:$0xf] }
  0x1a   :  { %641 = vmatpush.bf16.msrb.mxu0 %v1023_v18  ;;  %690 = vmatpush.bf16.msrb.mxu1 %v1087_v21  ;;  %v1135_v32 = vld [vmem:[%s1680_s5 + $0xc4] sm:$0xf0]  ;;  %v1133_v44 = vld [vmem:[%s1680_s5 + $0xb4] sm:$0xf0]  ;;  %v1116_v46 = vld [vmem:[%s1680_s5 + $0x34] sm:$0xf] }
  0x1b   :  { %973 = vmatmul.msk.bf16.gmra.mxu3 %vm232_vm1, %v53_v22  ;;  %v48_v22 = vld [vmem:[%s1675_s0 + $0x60] sm:$0xff]  ;;  %v1079_v35 = vor.u32 %v1135_v32, %v1078_v30  ;;  %v1071_v45 = vor.u32 %v1133_v44, %v1070_v43  ;;  %v1008_v47 = vld [vmem:[%s1680_s5 + $0x38] sm:$0xf0]  ;;  %v1132_v48 = vld [vmem:[%s1680_s5 + $0xb4] sm:$0xf] }
  0x1c   :  { %v58_v24 = vpack.c.bf16 %v49_v23, %v48_v22  ;;  %v50_v49 = vld [vmem:[%s1675_s0 + $0x70] sm:$0xff]  ;;  %v1011_v50 = vor.u32 %v1116_v46, %v1008_v47  ;;  %v1072_v51 = vld [vmem:[%s1680_s5 + $0xb8] sm:$0xf0]  ;;  %v998_v54 = vld [vmem:[%s1680_s5 + $0x20] sm:$0xf] }
  0x1d   :  { %941 = vmatmul.msk.bf16.gmra.mxu0 %vm92_vm2, %v79_v25  ;;  %949 = vmatmul.msk.bf16.gmra.mxu1 %vm92_vm2, %v79_v25  ;;  %v74_v25 = vld [vmem:[%s1676_s1 + $0x60] sm:$0xff]  ;;  %v1075_v53 = vor.u32 %v1132_v48, %v1072_v51  ;;  %v1131_v58 = vld [vmem:[%s1680_s5 + $0xa4] sm:$0xf0]  ;;  %v1000_v61 = vld [vmem:[%s1680_s5 + $0x28] sm:$0xf0] }
  0x1e   :  { %v84_v27 = vpack.c.bf16 %v75_v26, %v74_v25  ;;  %691 = vmatpush.bf16.msrb.mxu1 %v1079_v35  ;;  %v1062_v57 = vld [vmem:[%s1680_s5 + $0xa0] sm:$0xf]  ;;  %v1114_v59 = vld [vmem:[%s1680_s5 + $0x24] sm:$0xf]  ;;  %v1064_v63 = vld [vmem:[%s1680_s5 + $0xa8] sm:$0xf0] }
  0x1f   :  { %v1063_v60 = vor.u32 %v1131_v58, %v1062_v57  ;;  %v1130_v62 = vld [vmem:[%s1680_s5 + $0xa4] sm:$0xf]  ;;  %v76_v0 = vld [vmem:[%s1676_s1 + $0x70] sm:$0xff]  ;;  %v77_v1 = vld [vmem:[%s1676_s1 + $0x78] sm:$0xff]  ;;  %v1003_v2 = vor.u32 %v1114_v59, %v1000_v61 }
  0x20   :  { %v1067_v3 = vor.u32 %v1130_v62, %v1064_v63  ;;  %v990_v5 = vld [vmem:[%s1680_s5 + $0x10] sm:$0xf]  ;;  %v1112_v10 = vld [vmem:[%s1680_s5 + $0x14] sm:$0xf]  ;;  %v992_v11 = vld [vmem:[%s1680_s5 + $0x18] sm:$0xf0]  ;;  %v85_v17 = vpack.c.bf16 %v77_v1, %v76_v0 }
  0x21   :  { %v1054_v7 = vld [vmem:[%s1680_s5 + $0x90] sm:$0xf]  ;;  %v995_v13 = vor.u32 %v1112_v10, %v992_v11  ;;  %v1128_v14 = vld [vmem:[%s1680_s5 + $0x94] sm:$0xf]  ;;  %v1056_v15 = vld [vmem:[%s1680_s5 + $0x98] sm:$0xf0] }
  0x22   :  { %692 = vmatpush.bf16.msrb.mxu1 %v1071_v45  ;;  %v1059_v16 = vor.u32 %v1128_v14, %v1056_v15  ;;  %v982_v18 = vld [vmem:[%s1680_s5] sm:$0xf]  ;;  %v1111_v19 = vld [vmem:[%s1680_s5 + $0x4] sm:$0xf0]  ;;  %v1110_v23 = vld [vmem:[%s1680_s5 + $0x4] sm:$0xf] }
  0x23   :  { %v1046_v20 = vld [vmem:[%s1680_s5 + $0x80] sm:$0xf]  ;;  %v983_v21 = vor.u32 %v1111_v19, %v982_v18  ;;  %v1127_v22 = vld [vmem:[%s1680_s5 + $0x84] sm:$0xf0] }
  0x24   :  { %v1047_v25 = vor.u32 %v1127_v22, %v1046_v20 }
  0x26   :  { %693 = vmatpush.bf16.msrb.mxu1 %v1063_v60 }
  0x29   :  { %966 = vmatmul.msk.bf16.gmra.mxu2 %vm232_vm1, %v54_v28 }
  0x2b   :  { %974 = vmatmul.msk.bf16.gmra.mxu3 %vm232_vm1, %v54_v28  ;;  %v1014_v28 = vld [vmem:[%s1680_s5 + $0x40] sm:$0xf] }
  0x2d   :  { %942 = vmatmul.msk.bf16.gmra.mxu0 %vm92_vm2, %v80_v31  ;;  %950 = vmatmul.msk.bf16.gmra.mxu1 %vm92_vm2, %v80_v31  ;;  %v1015_v31 = vor.u32 %v1119_v29, %v1014_v28  ;;  %v1048_v28 = vld [vmem:[%s1680_s5 + $0x88] sm:$0xf0] }
  0x2f   :  { %642 = vmatpush.bf16.msrb.mxu0 %v1015_v31 }
  0x33   :  { %643 = vmatpush.bf16.msrb.mxu0 %v1007_v42 }
  0x39   :  { %967 = vmatmul.msk.bf16.gmra.mxu2 %vm232_vm1, %v55_v34 }
  0x3b   :  { %975 = vmatmul.msk.bf16.gmra.mxu3 %vm232_vm1, %v55_v34  ;;  %v1016_v34 = vld [vmem:[%s1680_s5 + $0x48] sm:$0xf0] }
  0x3c   :  { %v1019_v36 = vor.u32 %v1118_v33, %v1016_v34  ;;  %v355_v33 = vld [vmem:[%s1679_s4] sm:$0x3] }
  0x3d   :  { %943 = vmatmul.msk.bf16.gmra.mxu0 %vm92_vm2, %v81_v37  ;;  %951 = vmatmul.msk.bf16.gmra.mxu1 %vm92_vm2, %v81_v37  ;;  %v1134_v37 = vld [vmem:[%s1680_s5 + $0xc4] sm:$0xf]  ;;  %v1566_v40 = vperm.slane %v355_v33, 1 }
  0x3e   :  { %v1083_v39 = vor.u32 %v1134_v37, %v1080_v38  ;;  %740 = vmatpush.bf16.msrb.mxu2 %v1019_v36  ;;  %v1564_v36 = vperm.slane %v355_v33, 0 }
  0x40   :  { %789 = vmatpush.bf16.msrb.mxu3 %v1083_v39 }
  0x42   :  { %741 = vmatpush.bf16.msrb.mxu2 %v1011_v50 }
  0x44   :  { %790 = vmatpush.bf16.msrb.mxu3 %v1075_v53 }
  0x46   :  { %742 = vmatpush.bf16.msrb.mxu2 %v1003_v2 }
  0x48   :  { %791 = vmatpush.bf16.msrb.mxu3 %v1067_v3 }
  0x49   :  { %968 = vmatmul.msk.bf16.gmra.mxu2 %vm232_vm1, %v56_v52 }
  0x4a   :  { %743 = vmatpush.bf16.msrb.mxu2 %v995_v13 }
  0x4b   :  { %976 = vmatmul.msk.bf16.gmra.mxu3 %vm232_vm1, %v56_v52  ;;  %v51_v52 = vld [vmem:[%s1675_s0 + $0x78] sm:$0xff] }
  0x4c   :  { %v59_v4 = vpack.c.bf16 %v51_v52, %v50_v49  ;;  %792 = vmatpush.bf16.msrb.mxu3 %v1059_v16 }
  0x4d   :  { %944 = vmatmul.msk.bf16.gmra.mxu0 %vm92_vm2, %v82_v55  ;;  %952 = vmatmul.msk.bf16.gmra.mxu1 %vm92_vm2, %v82_v55  ;;  %v1115_v55 = vld [vmem:[%s1680_s5 + $0x24] sm:$0xf0] }
  0x4e   :  { %v999_v56 = vor.u32 %v1115_v55, %v998_v54 }
  0x50   :  { %644 = vmatpush.bf16.msrb.mxu0 %v999_v56 }
  0x59   :  { %969 = vmatmul.msk.bf16.gmra.mxu2 %vm232_vm1, %v57_v6 }
  0x5b   :  { %977 = vmatmul.msk.bf16.gmra.mxu3 %vm232_vm1, %v57_v6  ;;  %v1113_v6 = vld [vmem:[%s1680_s5 + $0x14] sm:$0xf0] }
  0x5c   :  { %v991_v8 = vor.u32 %v1113_v6, %v990_v5 }
  0x5d   :  { %945 = vmatmul.msk.bf16.gmra.mxu0 %vm92_vm2, %v83_v9  ;;  %953 = vmatmul.msk.bf16.gmra.mxu1 %vm92_vm2, %v83_v9  ;;  %v1129_v9 = vld [vmem:[%s1680_s5 + $0x94] sm:$0xf0] }
  0x5e   :  { %v1055_v12 = vor.u32 %v1129_v9, %v1054_v7  ;;  %645 = vmatpush.bf16.msrb.mxu0 %v991_v8 }
  0x60   :  { %694 = vmatpush.bf16.msrb.mxu1 %v1055_v12 }
  0x62   :  { %646 = vmatpush.bf16.msrb.mxu0 %v983_v21 }
  0x64   :  { %695 = vmatpush.bf16.msrb.mxu1 %v1047_v25 }
  0x69   :  { %970 = vmatmul.msk.bf16.gmra.mxu2 %vm232_vm1, %v58_v24 }
  0x6b   :  { %978 = vmatmul.msk.bf16.gmra.mxu3 %vm232_vm1, %v58_v24  ;;  %v984_v24 = vld [vmem:[%s1680_s5 + $0x8] sm:$0xf0] }
  0x6c   :  { %v987_v26 = vor.u32 %v1110_v23, %v984_v24 }
  0x6d   :  { %946 = vmatmul.msk.bf16.gmra.mxu0 %vm92_vm2, %v84_v27  ;;  %954 = vmatmul.msk.bf16.gmra.mxu1 %vm92_vm2, %v84_v27  ;;  %v1126_v27 = vld [vmem:[%s1680_s5 + $0x84] sm:$0xf] }
  0x6e   :  { %v1051_v29 = vor.u32 %v1126_v27, %v1048_v28  ;;  %744 = vmatpush.bf16.msrb.mxu2 %v987_v26 }
  0x70   :  { %793 = vmatpush.bf16.msrb.mxu3 %v1051_v29 }
  0x79   :  { %971 = vmatmul.msk.bf16.gmra.mxu2 %vm232_vm1, %v59_v4 }
  0x7b   :  { %979 = vmatmul.msk.bf16.gmra.mxu3 %vm232_vm1, %v59_v4 }
  0x7d   :  { %947 = vmatmul.msk.bf16.gmra.mxu0 %vm92_vm2, %v85_v17  ;;  %955 = vmatmul.msk.bf16.gmra.mxu1 %vm92_vm2, %v85_v17 }
  0x8a   :  { %v133_v30 = vpop.f32.mrf.mxu0  ;;  %v182_v31 = vpop.f32.mrf.mxu1 }
  0x8c   :  { %v266_v32 = vpop.f32.mrf.mxu2 }
  0x8d   :  { %v267_v35 = vadd.f32 %v266_v32, %v133_v30 }
  0x8e   :  { %v315_v34 = vpop.f32.mrf.mxu3 }
  0x8f   :  { %v316_v39 = vadd.f32 %v315_v34, %v182_v31  ;;  %v361_v42 = vadd.f32 %v1564_v36, %v267_v35 }
  0x91   :  { %v362_v45 = vadd.f32 %v1566_v40, %v316_v39  ;;  %v393_v48 = vmax.f32 %v361_v42, 0.0 }
  0x92   :  { %v135_v37 = vpop.f32.mrf.mxu0  ;;  %v184_v38 = vpop.f32.mrf.mxu1 }
  0x93   :  { %v394_v53 = vmax.f32 %v362_v45, 0.0 }
  0x94   :  { %v268_v41 = vpop.f32.mrf.mxu2 }
  0x95   :  { %v269_v43 = vadd.f32 %v268_v41, %v135_v37 }
  0x96   :  { %v317_v44 = vpop.f32.mrf.mxu3 }
  0x97   :  { %v363_v46 = vadd.f32 %v1564_v36, %v269_v43  ;;  %v318_v47 = vadd.f32 %v317_v44, %v184_v38 }
  0x99   :  { %v395_v49 = vmax.f32 %v363_v46, 0.0  ;;  %v364_v50 = vadd.f32 %v1566_v40, %v318_v47 }
  0x9a   :  { %v138_v51 = vpop.f32.mrf.mxu0  ;;  %v187_v52 = vpop.f32.mrf.mxu1 }
  0x9b   :  { %v396_v54 = vmax.f32 %v364_v50, 0.0  ;;  %v425_v55 = vpack.c.bf16 %v395_v49, %v393_v48 }
  0x9c   :  { %v271_v56 = vpop.f32.mrf.mxu2 }
  0x9d   :  { %647 = vmatmul.bf16.vlgmr.msrb.gmra.mxu0 %v425_v55  ;;  %v426_v57 = vpack.c.bf16 %v396_v54, %v394_v53  ;;  %745 = vmatmul.bf16.vlgmr.msrb.gmra.mxu2 %v425_v55  ;;  %v272_v59 = vadd.f32 %v271_v56, %v138_v51 }
  0x9e   :  { %v320_v58 = vpop.f32.mrf.mxu3 }
  0x9f   :  { %696 = vmatmul.bf16.vlgmr.msrb.gmra.mxu1 %v426_v57  ;;  %794 = vmatmul.bf16.vlgmr.msrb.gmra.mxu3 %v426_v57  ;;  %v321_v62 = vadd.f32 %v320_v58, %v187_v52  ;;  %v365_v0 = vadd.f32 %v1564_v36, %v272_v59 }
  0xa1   :  { %v366_v3 = vadd.f32 %v1566_v40, %v321_v62  ;;  %v397_v6 = vmax.f32 %v365_v0, 0.0 }
  0xa2   :  { %v140_v60 = vpop.f32.mrf.mxu0  ;;  %v189_v61 = vpop.f32.mrf.mxu1 }
  0xa3   :  { %v398_v11 = vmax.f32 %v366_v3, 0.0 }
  0xa4   :  { %v273_v63 = vpop.f32.mrf.mxu2 }
  0xa5   :  { %v274_v1 = vadd.f32 %v273_v63, %v140_v60 }
  0xa6   :  { %v322_v2 = vpop.f32.mrf.mxu3 }
  0xa7   :  { %v367_v4 = vadd.f32 %v1564_v36, %v274_v1  ;;  %v323_v5 = vadd.f32 %v322_v2, %v189_v61 }
  0xa9   :  { %v368_v7 = vadd.f32 %v1566_v40, %v323_v5  ;;  %v399_v8 = vmax.f32 %v367_v4, 0.0 }
  0xaa   :  { %v143_v9 = vpop.f32.mrf.mxu0  ;;  %v192_v10 = vpop.f32.mrf.mxu1 }
  0xab   :  { %v427_v12 = vpack.c.bf16 %v399_v8, %v397_v6  ;;  %v400_v13 = vmax.f32 %v368_v7, 0.0 }
  0xac   :  { %v276_v14 = vpop.f32.mrf.mxu2 }
  0xad   :  { %652 = vmatmul.bf16.gmra.mxu0 %v427_v12  ;;  %v428_v15 = vpack.c.bf16 %v400_v13, %v398_v11  ;;  %750 = vmatmul.bf16.gmra.mxu2 %v427_v12  ;;  %v277_v17 = vadd.f32 %v276_v14, %v143_v9 }
  0xae   :  { %v325_v16 = vpop.f32.mrf.mxu3 }
  0xaf   :  { %701 = vmatmul.bf16.gmra.mxu1 %v428_v15  ;;  %799 = vmatmul.bf16.gmra.mxu3 %v428_v15  ;;  %v326_v20 = vadd.f32 %v325_v16, %v192_v10  ;;  %v369_v22 = vadd.f32 %v1564_v36, %v277_v17 }
  0xb1   :  { %v370_v25 = vadd.f32 %v1566_v40, %v326_v20  ;;  %v401_v28 = vmax.f32 %v369_v22, 0.0 }
  0xb2   :  { %v145_v18 = vpop.f32.mrf.mxu0  ;;  %v194_v19 = vpop.f32.mrf.mxu1 }
  0xb3   :  { %v402_v33 = vmax.f32 %v370_v25, 0.0 }
  0xb4   :  { %v278_v21 = vpop.f32.mrf.mxu2 }
  0xb5   :  { %v279_v23 = vadd.f32 %v278_v21, %v145_v18 }
  0xb6   :  { %v327_v24 = vpop.f32.mrf.mxu3 }
  0xb7   :  { %v371_v26 = vadd.f32 %v1564_v36, %v279_v23  ;;  %v328_v27 = vadd.f32 %v327_v24, %v194_v19 }
  0xb9   :  { %v372_v29 = vadd.f32 %v1566_v40, %v328_v27  ;;  %v403_v30 = vmax.f32 %v371_v26, 0.0 }
  0xba   :  { %v148_v31 = vpop.f32.mrf.mxu0  ;;  %v197_v32 = vpop.f32.mrf.mxu1 }
  0xbb   :  { %v429_v34 = vpack.c.bf16 %v403_v30, %v401_v28  ;;  %v404_v35 = vmax.f32 %v372_v29, 0.0 }
  0xbc   :  { %v281_v37 = vpop.f32.mrf.mxu2 }
  0xbd   :  { %657 = vmatmul.bf16.gmra.mxu0 %v429_v34  ;;  %v430_v38 = vpack.c.bf16 %v404_v35, %v402_v33  ;;  %755 = vmatmul.bf16.gmra.mxu2 %v429_v34  ;;  %v282_v41 = vadd.f32 %v281_v37, %v148_v31 }
  0xbe   :  { %v330_v39 = vpop.f32.mrf.mxu3 }
  0xbf   :  { %706 = vmatmul.bf16.gmra.mxu1 %v430_v38  ;;  %804 = vmatmul.bf16.gmra.mxu3 %v430_v38  ;;  %v331_v44 = vadd.f32 %v330_v39, %v197_v32  ;;  %v373_v46 = vadd.f32 %v1564_v36, %v282_v41 }
  0xc1   :  { %v374_v49 = vadd.f32 %v1566_v40, %v331_v44  ;;  %v405_v52 = vmax.f32 %v373_v46, 0.0 }
  0xc2   :  { %v150_v42 = vpop.f32.mrf.mxu0  ;;  %v199_v43 = vpop.f32.mrf.mxu1 }
  0xc3   :  { %v406_v57 = vmax.f32 %v374_v49, 0.0 }
  0xc4   :  { %v283_v45 = vpop.f32.mrf.mxu2 }
  0xc5   :  { %v284_v47 = vadd.f32 %v283_v45, %v150_v42 }
  0xc6   :  { %v332_v48 = vpop.f32.mrf.mxu3 }
  0xc7   :  { %v375_v50 = vadd.f32 %v1564_v36, %v284_v47  ;;  %v333_v51 = vadd.f32 %v332_v48, %v199_v43 }
  0xc9   :  { %v376_v53 = vadd.f32 %v1566_v40, %v333_v51  ;;  %v407_v54 = vmax.f32 %v375_v50, 0.0 }
  0xca   :  { %v153_v55 = vpop.f32.mrf.mxu0  ;;  %v202_v56 = vpop.f32.mrf.mxu1 }
  0xcb   :  { %v431_v58 = vpack.c.bf16 %v407_v54, %v405_v52  ;;  %v408_v59 = vmax.f32 %v376_v53, 0.0 }
  0xcc   :  { %v286_v60 = vpop.f32.mrf.mxu2 }
  0xcd   :  { %662 = vmatmul.bf16.gmra.mxu0 %v431_v58  ;;  %v432_v61 = vpack.c.bf16 %v408_v59, %v406_v57  ;;  %760 = vmatmul.bf16.gmra.mxu2 %v431_v58  ;;  %v287_v63 = vadd.f32 %v286_v60, %v153_v55 }
  0xce   :  { %v335_v62 = vpop.f32.mrf.mxu3 }
  0xcf   :  { %711 = vmatmul.bf16.gmra.mxu1 %v432_v61  ;;  %809 = vmatmul.bf16.gmra.mxu3 %v432_v61  ;;  %v336_v2 = vadd.f32 %v335_v62, %v202_v56  ;;  %v377_v4 = vadd.f32 %v1564_v36, %v287_v63 }
  0xd1   :  { %v378_v7 = vadd.f32 %v1566_v40, %v336_v2  ;;  %v409_v10 = vmax.f32 %v377_v4, 0.0 }
  0xd2   :  { %v155_v0 = vpop.f32.mrf.mxu0  ;;  %v204_v1 = vpop.f32.mrf.mxu1 }
  0xd3   :  { %v410_v15 = vmax.f32 %v378_v7, 0.0 }
  0xd4   :  { %v288_v3 = vpop.f32.mrf.mxu2 }
  0xd5   :  { %v289_v5 = vadd.f32 %v288_v3, %v155_v0 }
  0xd6   :  { %v337_v6 = vpop.f32.mrf.mxu3 }
  0xd7   :  { %v379_v8 = vadd.f32 %v1564_v36, %v289_v5  ;;  %v338_v9 = vadd.f32 %v337_v6, %v204_v1 }
  0xd9   :  { %v411_v11 = vmax.f32 %v379_v8, 0.0  ;;  %v380_v12 = vadd.f32 %v1566_v40, %v338_v9 }
  0xda   :  { %v158_v13 = vpop.f32.mrf.mxu0  ;;  %v207_v14 = vpop.f32.mrf.mxu1 }
  0xdb   :  { %v412_v16 = vmax.f32 %v380_v12, 0.0  ;;  %v433_v17 = vpack.c.bf16 %v411_v11, %v409_v10 }
  0xdc   :  { %v291_v18 = vpop.f32.mrf.mxu2 }
  0xdd   :  { %667 = vmatmul.bf16.gmra.mxu0 %v433_v17  ;;  %v434_v19 = vpack.c.bf16 %v412_v16, %v410_v15  ;;  %765 = vmatmul.bf16.gmra.mxu2 %v433_v17  ;;  %v292_v21 = vadd.f32 %v291_v18, %v158_v13 }
  0xde   :  { %v340_v20 = vpop.f32.mrf.mxu3 }
  0xdf   :  { %716 = vmatmul.bf16.gmra.mxu1 %v434_v19  ;;  %814 = vmatmul.bf16.gmra.mxu3 %v434_v19  ;;  %v341_v24 = vadd.f32 %v340_v20, %v207_v14  ;;  %v381_v26 = vadd.f32 %v1564_v36, %v292_v21  ;;  %v473_v21 = vld [vmem:[%s1681_s6] sm:$0x3] }
  0xe1   :  { %v382_v29 = vadd.f32 %v1566_v40, %v341_v24  ;;  %v413_v32 = vmax.f32 %v381_v26, 0.0 }
  0xe2   :  { %v160_v22 = vpop.f32.mrf.mxu0  ;;  %v209_v23 = vpop.f32.mrf.mxu1 }
  0xe3   :  { %v414_v38 = vmax.f32 %v382_v29, 0.0 }
  0xe4   :  { %v293_v25 = vpop.f32.mrf.mxu2 }
  0xe5   :  { %v294_v27 = vadd.f32 %v293_v25, %v160_v22  ;;  %v1603_v22 = vperm.slane %v473_v21, 0 }
  0xe6   :  { %v342_v28 = vpop.f32.mrf.mxu3 }
  0xe7   :  { %v383_v30 = vadd.f32 %v1564_v36, %v294_v27  ;;  %v343_v31 = vadd.f32 %v342_v28, %v209_v23 }
  0xe9   :  { %v415_v33 = vmax.f32 %v383_v30, 0.0  ;;  %v384_v34 = vadd.f32 %v1566_v40, %v343_v31 }
  0xea   :  { %v163_v35 = vpop.f32.mrf.mxu0  ;;  %v212_v37 = vpop.f32.mrf.mxu1 }
  0xeb   :  { %v416_v39 = vmax.f32 %v384_v34, 0.0  ;;  %v435_v41 = vpack.c.bf16 %v415_v33, %v413_v32 }
  0xec   :  { %v296_v42 = vpop.f32.mrf.mxu2 }
  0xed   :  { %672 = vmatmul.bf16.gmra.mxu0 %v435_v41  ;;  %v436_v43 = vpack.c.bf16 %v416_v39, %v414_v38  ;;  %770 = vmatmul.bf16.gmra.mxu2 %v435_v41  ;;  %v297_v45 = vadd.f32 %v296_v42, %v163_v35 }
  0xee   :  { %v345_v44 = vpop.f32.mrf.mxu3 }
  0xef   :  { %721 = vmatmul.bf16.gmra.mxu1 %v436_v43  ;;  %819 = vmatmul.bf16.gmra.mxu3 %v436_v43  ;;  %v346_v48 = vadd.f32 %v345_v44, %v212_v37  ;;  %v385_v50 = vadd.f32 %v1564_v36, %v297_v45 }
  0xf1   :  { %v386_v53 = vadd.f32 %v1566_v40, %v346_v48  ;;  %v417_v56 = vmax.f32 %v385_v50, 0.0 }
  0xf2   :  { %v165_v46 = vpop.f32.mrf.mxu0  ;;  %v214_v47 = vpop.f32.mrf.mxu1 }
  0xf3   :  { %v418_v60 = vmax.f32 %v386_v53, 0.0 }
  0xf4   :  { %v298_v49 = vpop.f32.mrf.mxu2 }
  0xf5   :  { %v299_v51 = vadd.f32 %v298_v49, %v165_v46 }
  0xf6   :  { %v347_v52 = vpop.f32.mrf.mxu3 }
  0xf7   :  { %v387_v54 = vadd.f32 %v1564_v36, %v299_v51  ;;  %v348_v55 = vadd.f32 %v347_v52, %v214_v47 }
  0xf9   :  { %v419_v57 = vmax.f32 %v387_v54, 0.0  ;;  %v388_v58 = vadd.f32 %v1566_v40, %v348_v55 }
  0xfa   :  { %v168_v59 = vpop.f32.mrf.mxu0  ;;  %v217_v63 = vpop.f32.mrf.mxu1 }
  0xfb   :  { %v420_v61 = vmax.f32 %v388_v58, 0.0  ;;  %v437_v62 = vpack.c.bf16 %v419_v57, %v417_v56 }
  0xfc   :  { %v301_v0 = vpop.f32.mrf.mxu2 }
  0xfd   :  { %677 = vmatmul.bf16.gmra.mxu0 %v437_v62  ;;  %v438_v1 = vpack.c.bf16 %v420_v61, %v418_v60  ;;  %775 = vmatmul.bf16.gmra.mxu2 %v437_v62  ;;  %v302_v3 = vadd.f32 %v301_v0, %v168_v59 }
  0xfe   :  { %v350_v2 = vpop.f32.mrf.mxu3 }
  0xff   :  { %726 = vmatmul.bf16.gmra.mxu1 %v438_v1  ;;  %824 = vmatmul.bf16.gmra.mxu3 %v438_v1  ;;  %v351_v4 = vadd.f32 %v350_v2, %v217_v63  ;;  %v389_v7 = vadd.f32 %v1564_v36, %v302_v3 }
 0x101   :  { %v390_v11 = vadd.f32 %v1566_v40, %v351_v4  ;;  %v421_v14 = vmax.f32 %v389_v7, 0.0 }
 0x102   :  { %v170_v5 = vpop.f32.mrf.mxu0  ;;  %v219_v9 = vpop.f32.mrf.mxu1 }
 0x103   :  { %v422_v17 = vmax.f32 %v390_v11, 0.0 }
 0x104   :  { %v303_v6 = vpop.f32.mrf.mxu2 }
 0x105   :  { %v304_v8 = vadd.f32 %v303_v6, %v170_v5 }
 0x106   :  { %v352_v10 = vpop.f32.mrf.mxu3 }
 0x107   :  { %v391_v12 = vadd.f32 %v1564_v36, %v304_v8  ;;  %v353_v13 = vadd.f32 %v352_v10, %v219_v9 }
 0x109   :  { %v423_v15 = vmax.f32 %v391_v12, 0.0  ;;  %v392_v16 = vadd.f32 %v1566_v40, %v353_v13  ;;  %v1606_v40 = vperm.slane %v473_v21, 1 }
 0x10b   :  { %v424_v18 = vmax.f32 %v392_v16, 0.0  ;;  %v439_v19 = vpack.c.bf16 %v423_v15, %v421_v14 }
 0x10d   :  { %682 = vmatmul.bf16.gmra.mxu0 %v439_v19  ;;  %v440_v20 = vpack.c.bf16 %v424_v18, %v422_v17  ;;  %780 = vmatmul.bf16.gmra.mxu2 %v439_v19 }
 0x10f   :  { %731 = vmatmul.bf16.gmra.mxu1 %v440_v20  ;;  %829 = vmatmul.bf16.gmra.mxu3 %v440_v20 }
 0x11a   :  { %v648_v36 = vpop.f32.mrf.mxu0 }
 0x11b   :  { %v649_v23 = vadd.f32 %v648_v36, %v1603_v22 }
 0x11c   :  { %v697_v24 = vpop.f32.mrf.mxu1 }
 0x11d   :  { %v698_v25 = vadd.f32 %v697_v24, %v649_v23 }
 0x11f   :  { %v835_v34 = vmax.f32 %v698_v25, 0.0 }
 0x120   :  { %v746_v26 = vpop.f32.mrf.mxu2 }
 0x121   :  { %v747_v27 = vadd.f32 %v746_v26, %v1606_v40 }
 0x122   :  { %v795_v28 = vpop.f32.mrf.mxu3  ;;  %v650_v29 = vpop.f32.mrf.mxu0 }
 0x123   :  { %v796_v30 = vadd.f32 %v795_v28, %v747_v27  ;;  %v651_v31 = vadd.f32 %v650_v29, %v1603_v22 }
 0x124   :  { %v699_v32 = vpop.f32.mrf.mxu1 }
 0x125   :  { %v700_v33 = vadd.f32 %v699_v32, %v651_v31  ;;  %v836_v46 = vmax.f32 %v796_v30, 0.0 }
 0x127   :  { %v837_v35 = vmax.f32 %v700_v33, 0.0 }
 0x128   :  { %v748_v37 = vpop.f32.mrf.mxu2 }
 0x129   :  { %v1610_v38 = vpack.c.bf16 %v837_v35, %v835_v34  ;;  %v749_v39 = vadd.f32 %v748_v37, %v1606_v40 }
 0x12a   :  { %v797_v41 = vpop.f32.mrf.mxu3  ;;  %v653_v42 = vpop.f32.mrf.mxu0 }
 0x12b   :  { %v798_v43 = vadd.f32 %v797_v41, %v749_v39  ;;  %v654_v44 = vadd.f32 %v653_v42, %v1603_v22 }
 0x12c   :  { %v702_v45 = vpop.f32.mrf.mxu1 }
 0x12d   :  { %v838_v47 = vmax.f32 %v798_v43, 0.0  ;;  %v703_v48 = vadd.f32 %v702_v45, %v654_v44 }
 0x12f   :  { %v1614_v49 = vpack.c.bf16 %v838_v47, %v836_v46  ;;  %v839_v58 = vmax.f32 %v703_v48, 0.0 }
 0x130   :  { %v751_v50 = vpop.f32.mrf.mxu2 }
 0x131   :  { %v752_v51 = vadd.f32 %v751_v50, %v1606_v40 }
 0x132   :  { %v800_v52 = vpop.f32.mrf.mxu3  ;;  %v655_v53 = vpop.f32.mrf.mxu0 }
 0x133   :  { %v801_v54 = vadd.f32 %v800_v52, %v752_v51  ;;  %v656_v55 = vadd.f32 %v655_v53, %v1603_v22 }
 0x134   :  { %v704_v56 = vpop.f32.mrf.mxu1 }
 0x135   :  { %v705_v57 = vadd.f32 %v704_v56, %v656_v55  ;;  %v840_v4 = vmax.f32 %v801_v54, 0.0 }
 0x137   :  { %v841_v59 = vmax.f32 %v705_v57, 0.0 }
 0x138   :  { %v753_v60 = vpop.f32.mrf.mxu2 }
 0x139   :  { %v1618_v61 = vpack.c.bf16 %v841_v59, %v839_v58  ;;  %v754_v62 = vadd.f32 %v753_v60, %v1606_v40 }
 0x13a   :  { %v802_v63 = vpop.f32.mrf.mxu3  ;;  %v658_v0 = vpop.f32.mrf.mxu0 }
 0x13b   :  { %v803_v1 = vadd.f32 %v802_v63, %v754_v62  ;;  %v659_v2 = vadd.f32 %v658_v0, %v1603_v22 }
 0x13c   :  { %v707_v3 = vpop.f32.mrf.mxu1 }
 0x13d   :  { %v842_v5 = vmax.f32 %v803_v1, 0.0  ;;  %v708_v6 = vadd.f32 %v707_v3, %v659_v2 }
 0x13f   :  { %v1622_v7 = vpack.c.bf16 %v842_v5, %v840_v4  ;;  %v843_v16 = vmax.f32 %v708_v6, 0.0 }
 0x140   :  { %v756_v8 = vpop.f32.mrf.mxu2 }
 0x141   :  { %v757_v9 = vadd.f32 %v756_v8, %v1606_v40 }
 0x142   :  { %v805_v10 = vpop.f32.mrf.mxu3  ;;  %v660_v11 = vpop.f32.mrf.mxu0 }
 0x143   :  { %v806_v12 = vadd.f32 %v805_v10, %v757_v9  ;;  %v661_v13 = vadd.f32 %v660_v11, %v1603_v22 }
 0x144   :  { %v709_v14 = vpop.f32.mrf.mxu1 }
 0x145   :  { %v710_v15 = vadd.f32 %v709_v14, %v661_v13  ;;  %v844_v26 = vmax.f32 %v806_v12, 0.0 }
 0x147   :  { %v845_v17 = vmax.f32 %v710_v15, 0.0 }
 0x148   :  { %v758_v18 = vpop.f32.mrf.mxu2 }
 0x149   :  { %v1626_v19 = vpack.c.bf16 %v845_v17, %v843_v16  ;;  %v759_v20 = vadd.f32 %v758_v18, %v1606_v40 }
 0x14a   :  { %v807_v21 = vpop.f32.mrf.mxu3  ;;  %v663_v36 = vpop.f32.mrf.mxu0 }
 0x14b   :  { %v808_v23 = vadd.f32 %v807_v21, %v759_v20  ;;  %v664_v24 = vadd.f32 %v663_v36, %v1603_v22 }
 0x14c   :  { %v712_v25 = vpop.f32.mrf.mxu1 }
 0x14d   :  { %v846_v27 = vmax.f32 %v808_v23, 0.0  ;;  %v713_v28 = vadd.f32 %v712_v25, %v664_v24 }
 0x14f   :  { %v1630_v29 = vpack.c.bf16 %v846_v27, %v844_v26  ;;  %v847_v41 = vmax.f32 %v713_v28, 0.0 }
 0x150   :  { %v761_v30 = vpop.f32.mrf.mxu2 }
 0x151   :  { %v762_v31 = vadd.f32 %v761_v30, %v1606_v40 }
 0x152   :  { %v810_v32 = vpop.f32.mrf.mxu3  ;;  %v665_v33 = vpop.f32.mrf.mxu0 }
 0x153   :  { %v811_v34 = vadd.f32 %v810_v32, %v762_v31  ;;  %v666_v35 = vadd.f32 %v665_v33, %v1603_v22 }
 0x154   :  { %v714_v37 = vpop.f32.mrf.mxu1 }
 0x155   :  { %v715_v39 = vadd.f32 %v714_v37, %v666_v35  ;;  %v848_v52 = vmax.f32 %v811_v34, 0.0 }
 0x157   :  { %v849_v42 = vmax.f32 %v715_v39, 0.0 }
 0x158   :  { %v763_v43 = vpop.f32.mrf.mxu2 }
 0x159   :  { %v1634_v44 = vpack.c.bf16 %v849_v42, %v847_v41  ;;  %v764_v45 = vadd.f32 %v763_v43, %v1606_v40 }
 0x15a   :  { %v812_v46 = vpop.f32.mrf.mxu3  ;;  %v668_v47 = vpop.f32.mrf.mxu0 }
 0x15b   :  { %v813_v48 = vadd.f32 %v812_v46, %v764_v45  ;;  %v669_v50 = vadd.f32 %v668_v47, %v1603_v22 }
 0x15c   :  { %v717_v51 = vpop.f32.mrf.mxu1 }
 0x15d   :  { %v850_v53 = vmax.f32 %v813_v48, 0.0  ;;  %v718_v54 = vadd.f32 %v717_v51, %v669_v50 }
 0x15f   :  { %v1638_v55 = vpack.c.bf16 %v850_v53, %v848_v52  ;;  %v851_v1 = vmax.f32 %v718_v54, 0.0 }
 0x160   :  { %v766_v56 = vpop.f32.mrf.mxu2 }
 0x161   :  { %v767_v57 = vadd.f32 %v766_v56, %v1606_v40 }
 0x162   :  { %v815_v58 = vpop.f32.mrf.mxu3  ;;  %v670_v59 = vpop.f32.mrf.mxu0 }
 0x163   :  { %v816_v60 = vadd.f32 %v815_v58, %v767_v57  ;;  %v671_v62 = vadd.f32 %v670_v59, %v1603_v22 }
 0x164   :  { %v719_v63 = vpop.f32.mrf.mxu1 }
 0x165   :  { %v720_v0 = vadd.f32 %v719_v63, %v671_v62  ;;  %v852_v11 = vmax.f32 %v816_v60, 0.0 }
 0x167   :  { %v853_v2 = vmax.f32 %v720_v0, 0.0 }
 0x168   :  { %v768_v3 = vpop.f32.mrf.mxu2 }
 0x169   :  { %v1642_v4 = vpack.c.bf16 %v853_v2, %v851_v1  ;;  %v769_v5 = vadd.f32 %v768_v3, %v1606_v40 }
 0x16a   :  { %v817_v6 = vpop.f32.mrf.mxu3  ;;  %v673_v8 = vpop.f32.mrf.mxu0 }
 0x16b   :  { %v818_v9 = vadd.f32 %v817_v6, %v769_v5  ;;  %v674_v2 = vadd.f32 %v673_v8, %v1603_v22 }
 0x16c   :  { %v722_v10 = vpop.f32.mrf.mxu1 }
 0x16d   :  { %v854_v12 = vmax.f32 %v818_v9, 0.0 }
 0x16f   :  { %v1645_v13 = vpack.c.bf16 %v854_v12, %v852_v11 }
 0x170   :  { %v771_v14 = vpop.f32.mrf.mxu2 }
 0x172   :  { %v820_v15 = vpop.f32.mrf.mxu3  ;;  %v675_v16 = vpop.f32.mrf.mxu0 }
 0x173   :  { %v676_v60 = vadd.f32 %v675_v16, %v1603_v22  ;;  %v772_v16 = vadd.f32 %v771_v14, %v1606_v40  ;;  %v1171_v14 = vmov 0  }
 0x174   :  { %v724_v17 = vpop.f32.mrf.mxu1  ;;  %1144 = vset.pattern.permute.xlu0 %v1171_v14 }
 0x175   :  { %v725_v9 = vadd.f32 %v724_v17, %v676_v60 }
 0x178   :  { %v773_v18 = vpop.f32.mrf.mxu2 }
 0x17a   :  { %v822_v20 = vpop.f32.mrf.mxu3  ;;  %v678_v21 = vpop.f32.mrf.mxu0 }
 0x17b   :  { %v679_v46 = vadd.f32 %v678_v21, %v1603_v22  ;;  %v723_v21 = vadd.f32 %v722_v10, %v674_v2  ;;  %v867_v10 = vld [vmem:[%s1682_s7] sm:$0x3]  ;;  %s1172_s7 = smov [#allocation3]  }
 0x17c   :  { %v727_v36 = vpop.f32.mrf.mxu1  ;;  %892 = vst [vmem:[#allocation1] ss:$9 sm:$0xff] %v867_v10  ;;  %s929_s8 = sshll.u32 %s1172_s7, 4  ;;  %s930_s8 = int_to_ptr.vmem [resolvable:$true] %s929_s8 }
 0x17d   :  { %v728_v57 = vadd.f32 %v727_v36, %v679_v46  ;;  %v774_v36 = vadd.f32 %v773_v18, %v1606_v40 }
 0x17f   :  { %v859_v3 = vmax.f32 %v728_v57, 0.0 }
 0x180   :  { %v776_v23 = vpop.f32.mrf.mxu2 }
 0x181   :  { %v777_v62 = vadd.f32 %v776_v23, %v1606_v40  ;;  %v857_v23 = vmax.f32 %v725_v9, 0.0 }
 0x182   :  { %v825_v24 = vpop.f32.mrf.mxu3  ;;  %v680_v25 = vpop.f32.mrf.mxu0 }
 0x183   :  { %v681_v42 = vadd.f32 %v680_v25, %v1603_v22  ;;  %v826_v11 = vadd.f32 %v825_v24, %v777_v62 }
 0x184   :  { %v729_v26 = vpop.f32.mrf.mxu1 }
 0x185   :  { %v730_v51 = vadd.f32 %v729_v26, %v681_v42  ;;  %v860_v26 = vmax.f32 %v826_v11, 0.0 }
 0x187   :  { %v861_v63 = vmax.f32 %v730_v51, 0.0 }
 0x188   :  { %v778_v27 = vpop.f32.mrf.mxu2 }
 0x189   :  { %v779_v58 = vadd.f32 %v778_v27, %v1606_v40  ;;  %v880_v12 = vpack.c.bf16 %v861_v63, %v859_v3  ;;  %v855_v27 = vmax.f32 %v723_v21, 0.0 }
 0x18a   :  { %v827_v28 = vpop.f32.mrf.mxu3  ;;  %v683_v30 = vpop.f32.mrf.mxu0 }
 0x18b   :  { %v684_v32 = vadd.f32 %v683_v30, %v1603_v22  ;;  %v828_v5 = vadd.f32 %v827_v28, %v779_v58  ;;  %v823_v30 = vadd.f32 %v822_v20, %v774_v36  ;;  %v878_v8 = vpack.c.bf16 %v857_v23, %v855_v27 }
 0x18c   :  { %v732_v31 = vpop.f32.mrf.mxu1 }
 0x18d   :  { %v733_v37 = vadd.f32 %v732_v31, %v684_v32  ;;  %v862_v25 = vmax.f32 %v828_v5, 0.0  ;;  %v858_v28 = vmax.f32 %v823_v30, 0.0 }
 0x18f   :  { %v863_v47 = vmax.f32 %v733_v37, 0.0  ;;  %v881_v31 = vpack.c.bf16 %v862_v25, %v860_v26 }
 0x190   :  { %v781_v33 = vpop.f32.mrf.mxu2 }
 0x191   :  { %v782_v43 = vadd.f32 %v781_v33, %v1606_v40 }
 0x192   :  { %v830_v34 = vpop.f32.mrf.mxu3  ;;  %v685_v35 = vpop.f32.mrf.mxu0 }
 0x193   :  { %v686_v39 = vadd.f32 %v685_v35, %v1603_v22  ;;  %v831_v52 = vadd.f32 %v830_v34, %v782_v43  ;;  %v821_v22 = vadd.f32 %v820_v15, %v772_v16 }
 0x194   :  { %v734_v41 = vpop.f32.mrf.mxu1 }
 0x195   :  { %v735_v45 = vadd.f32 %v734_v41, %v686_v39  ;;  %v864_v0 = vmax.f32 %v831_v52, 0.0  ;;  %v856_v17 = vmax.f32 %v821_v22, 0.0 }
 0x197   :  { %v865_v48 = vmax.f32 %v735_v45, 0.0  ;;  %v879_v24 = vpack.c.bf16 %v858_v28, %v856_v17 }
 0x198   :  { %v783_v50 = vpop.f32.mrf.mxu2 }
 0x199   :  { %v882_v53 = vpack.c.bf16 %v865_v48, %v863_v47  ;;  %v784_v54 = vadd.f32 %v783_v50, %v1606_v40  ;;  %v884_v40 = vld [vmem:[#allocation2] sm:$0x1] }
 0x19a   :  { %v832_v56 = vpop.f32.mrf.mxu3  ;;  %887 = vperm.xlu0 %1144, %v884_v40  }
 0x19b   :  { %v833_v59 = vadd.f32 %v832_v56, %v784_v54  ;;  %897 = vmatpush.bf16.xpose.msra.mxu0 %v882_v53 }
 0x19d   :  { %v866_v1 = vmax.f32 %v833_v59, 0.0 }
 0x19f   :  { %v883_v6 = vpack.c.bf16 %v866_v1, %v864_v0 }
 0x1a1   :  { %910 = vmatpush.bf16.xpose.msra.mxu1 %v883_v6 }
 0x1a3   :  { %898 = vmatpush.bf16.xpose.msra.mxu0 %v880_v12 }
 0x1a9   :  { %911 = vmatpush.bf16.xpose.msra.mxu1 %v881_v31 }
 0x1ab   :  { %899 = vmatpush.bf16.xpose.msra.mxu0 %v878_v8 }
 0x1b1   :  { %912 = vmatpush.bf16.xpose.msra.mxu1 %v879_v24 }
 0x1b3   :  { %900 = vmatpush.bf16.xpose.msra.mxu0 %v1642_v4  ;;  %v893_v4 = vld [vmem:[#allocation1] sm:$0xff] }
 0x1b9   :  { %913 = vmatpush.bf16.xpose.msra.mxu1 %v1645_v13 }
 0x1bb   :  { %901 = vmatpush.bf16.xpose.msra.mxu0 %v1634_v44  ;;  %v894_v44 = vld [vmem:[#allocation1 + $0x9] sm:$0xff] }
 0x1c1   :  { %914 = vmatpush.bf16.xpose.msra.mxu1 %v1638_v55 }
 0x1c3   :  { %902 = vmatpush.bf16.xpose.msra.mxu0 %v1626_v19 }
 0x1c9   :  { %915 = vmatpush.bf16.xpose.msra.mxu1 %v1630_v29 }
 0x1cb   :  { %903 = vmatpush.bf16.xpose.msra.mxu0 %v1618_v61 }
 0x1d1   :  { %916 = vmatpush.bf16.xpose.msra.mxu1 %v1622_v7 }
 0x1d3   :  { %904 = vmatpush.bf16.xpose.msra.mxu0 %v1610_v38 }
 0x1d9   :  { %917 = vmatpush.bf16.xpose.msra.mxu1 %v1614_v49 }
 0x1da   :  { %905 = vmatmul.bf16.vlgmr.msra.gmra.mxu0 %v893_v4 }
 0x1e0   :  { %918 = vmatmul.bf16.vlgmr.msra.gmra.mxu1 %v894_v44 }
 0x20c   :  { %v888_v55 = vpop.permute.xlu0 %887 }
 0x20d   :  { %v890_v13 = vperm.slane %v888_v55, 0 }
 0x257   :  { %v906_v15 = vpop.f32.mrf.mxu0 }
 0x258   :  { %v907_v18 = vadd.f32 %v906_v15, %v890_v13 }
 0x25d   :  { %v919_v61 = vpop.f32.mrf.mxu1 }
 0x25e   :  { %v920_v7 = vadd.f32 %v919_v61, %v907_v18 }
 0x25f   :  { %v908_v38 = vpop.f32.mrf.mxu0 }
 0x260   :  { %923 = vst [vmem:[#allocation3] sm:$0x1] %v920_v7 }
 0x261   :  { %934 = dma.vmem_to_hbm [thread:$0]  %s930_s8, 16, %s932_s22, [#allocation4]  }
 0x265   :  { %v921_v49 = vpop.f32.mrf.mxu1 }
 0x266   :  { %1169 = dma.done.wait [#allocation4], 16  }
 0x267   :  { %1170 = vsyncadd [#allocation4], 4294967280 }
 0x268   :  { %939 = vsyncpa [#allocation4], 1 }

</bundles_post_ra>
